<compile_context>
chip_gen: v5e
topology: v5e:2x2
jax: 0.10.0
libtpu: 0.0.40
codegen_flags: <defaults>
</compile_context>

<pallas_src>
import functools

import jax
import jax.numpy as jnp
from jax.experimental import pallas as pl
from jax.experimental.pallas import tpu as pltpu


def _round_up(v: int, m: int) -> int:
    return ((v + m - 1) // m) * m


def _lsr_kernel(x_ref, t_ref, loss_ref, *, smooth_e: float, num_classes: int):
    # x_ref:    (TB, C) logits in native dtype (widened to f32 on the VPU)
    # t_ref:    (TB, 1) i32 labels
    # loss_ref: (TB, 1) f32 per-row smoothed NLL
    x = x_ref[...].astype(jnp.float32)                         # (TB, C)
    t = t_ref[...]                                             # (TB, 1)

    # Numerically stable log-sum-exp in x-space (no materialized z = x - m).
    m = jnp.max(x, axis=1, keepdims=True)                      # XLU pass 1
    lse = m + jnp.log(jnp.sum(jnp.exp(x - m), axis=1, keepdims=True))  # EUP + XLU pass 2

    # Smoothed weights: e/C everywhere, plus (1-e) on the target class.
    class_ids = jax.lax.broadcasted_iota(jnp.int32, x.shape, 1)        # (TB, C)
    w_hit = jnp.float32(1.0 - smooth_e + smooth_e / num_classes)
    w_miss = jnp.float32(smooth_e / num_classes)
    w = jnp.where(class_ids == t, w_hit, w_miss)                        # (TB, C)
    weighted = jnp.sum(w * x, axis=1, keepdims=True)            # XLU pass 3

    # loss = sum_c(-(x - lse) * w) = lse - sum_c(w * x)   (since sum_c w = 1)
    loss_ref[...] = lse - weighted


def lsr_loss(x, target, e=0.1, reduction="mean"):
    """Pallas equivalent of LSR.forward(x, target).

    x:      (B, C) float logits (f32 or bf16; streamed in native dtype)
    target: (B,)   int labels
    """
    if x.shape[0] != target.shape[0]:
        raise ValueError("Expected input batchsize ({}) to match target "
                         "batch_size({})".format(x.shape[0], target.shape[0]))
    if x.ndim != 2:
        raise ValueError("Only 2 dimension tensor are implemented, "
                         "(got {})".format(x.shape))

    B, C = x.shape
    itemsize = jnp.dtype(x.dtype).itemsize

    # ---- Row-tile selection sized on the f32 working set per block:
    #   2 x native-dtype input (double-buffered)
    # + ~4 x (TB, C) f32 elementwise temporaries inside the kernel
    # + 4 lane-padded (TB, 1) buffers (target + loss, double-buffered) @ 512 B/row
    row_bytes = 2 * C * itemsize + 4 * C * 4 + 4 * 128 * 4
    target_working_set = 20 * 1024 * 1024                      # ~20 MiB blocks
    TB = max(8, (target_working_set // row_bytes) // 8 * 8)
    TB = min(TB, _round_up(B, 8))
    # Keep >= 2 grid steps when there is enough work, so the "parallel" batch
    # axis can be split across TensorCores (v7x megacore).
    if B > 8 and pl.cdiv(B, TB) < 2:
        TB = max(8, _round_up(pl.cdiv(B, 2), 8))
    grid = (pl.cdiv(B, TB),)

    # No batch padding: the last block may overhang B.  Out-of-bounds reads are
    # unspecified but per-row only, and out-of-bounds writes are dropped.
    t2d = target.reshape(B, 1).astype(jnp.int32)

    cost = pl.CostEstimate(
        flops=6 * B * C,
        transcendentals=B * C,
        bytes_accessed=B * C * itemsize + 8 * B,
    )

    per_row = pl.pallas_call(
        functools.partial(_lsr_kernel, smooth_e=float(e), num_classes=C),
        out_shape=jax.ShapeDtypeStruct((B, 1), jnp.float32),
        grid_spec=pltpu.PrefetchScalarGridSpec(
            num_scalar_prefetch=0,
            grid=grid,
            in_specs=[
                pl.BlockSpec((TB, C), lambda i: (i, 0)),
                pl.BlockSpec((TB, 1), lambda i: (i, 0)),
            ],
            out_specs=pl.BlockSpec((TB, 1), lambda i: (i, 0)),
        ),
        compiler_params=pltpu.CompilerParams(
            dimension_semantics=("parallel",),
            vmem_limit_bytes=48 * 1024 * 1024),
        cost_estimate=cost,
    )(x, t2d)

    loss = per_row[:, 0]                                        # (B,)
    if reduction == "none":
        return loss
    elif reduction == "sum":
        return jnp.sum(loss)
    elif reduction == "mean":
        return jnp.mean(loss)
    else:
        raise ValueError("unrecognized option, expect reduction to be one of "
                         "none, mean, sum")


def _lsr_reference(x, target, e=0.1, reduction="mean"):
    """Pure-JAX reference mirroring the PyTorch module."""
    B, C = x.shape
    xf = x.astype(jnp.float32)
    one_hot = jax.nn.one_hot(target, C, dtype=jnp.float32) * (1.0 - e) + e / C
    log_p = jax.nn.log_softmax(xf, axis=1)
    loss = jnp.sum(-log_p * one_hot, axis=1)
    if reduction == "none":
        return loss
    if reduction == "sum":
        return jnp.sum(loss)
    return jnp.mean(loss)


if __name__ == "__main__":
    key = jax.random.PRNGKey(0)

    # (B, C, dtype, reduction): lane-aligned, ragged batch/classes (exercises
    # the no-pad overhanging last block), and bf16 native streaming.
    cases = [
        (8, 128, jnp.float32, "mean"),
        (8, 128, jnp.float32, "sum"),
        (8, 128, jnp.float32, "none"),
        (10, 200, jnp.float32, "mean"),   # ragged B (overhang) and non-128 C
        (16, 256, jnp.bfloat16, "mean"),  # bf16 logits streamed natively
    ]

    for idx, (B, C, dt, red) in enumerate(cases):
        kx, kt = jax.random.split(jax.random.fold_in(key, idx))
        x = jax.random.normal(kx, (B, C), dtype=jnp.float32).astype(dt)
        target = jax.random.randint(kt, (B,), 0, C, dtype=jnp.int32)

        out = lsr_loss(x, target, e=0.1, reduction=red)
        out = jax.block_until_ready(out)
        ref = _lsr_reference(x, target, e=0.1, reduction=red)

        assert jnp.allclose(out, ref, atol=1e-4, rtol=1e-5), (
            (B, C, dt, red), out, ref)

    print("KERNEL_OK")
</pallas_src>

<mosaic_0001>
module attributes {stable_mosaic.version = 11 : i64} {
  func.func @_lsr_kernel(%arg0: i32, %arg1: memref<8x128xf32, #tpu.memory_space<vmem>>, %arg2: memref<8x1xi32, #tpu.memory_space<vmem>>, %arg3: memref<8x1xf32, #tpu.memory_space<vmem>>) attributes {dimension_semantics = [#tpu.dimension_semantics<parallel>], iteration_bounds = array<i64: 1>, scalar_prefetch = 0 : i64, scratch_operands = 0 : i64, tpu.core_type = #tpu.core_type<tc>, window_params = [{transform_indices = @transform_0, window_bounds = array<i64: 8, 128>}, {transform_indices = @transform_1, window_bounds = array<i64: 8, 1>}, {transform_indices = @transform_2, window_bounds = array<i64: 8, 1>}]} {
    %c0 = arith.constant 0 : index
    %c0_0 = arith.constant 0 : index
    %0 = vector.load %arg1[%c0, %c0_0] : memref<8x128xf32, #tpu.memory_space<vmem>>, vector<8x128xf32>
    %c0_1 = arith.constant 0 : index
    %c0_2 = arith.constant 0 : index
    %1 = vector.load %arg2[%c0_1, %c0_2] : memref<8x1xi32, #tpu.memory_space<vmem>>, vector<8x1xi32>
    %cst = arith.constant dense<0xFF800000> : vector<8xf32>
    %2 = vector.multi_reduction <maximumf>, %0, %cst [1] : vector<8x128xf32> to vector<8xf32>
    %3 = vector.shape_cast %2 : vector<8xf32> to vector<8x1xf32>
    %4 = vector.broadcast %3 : vector<8x1xf32> to vector<8x128xf32>
    %5 = arith.subf %0, %4 : vector<8x128xf32>
    %6 = math.exp %5 : vector<8x128xf32>
    %cst_3 = arith.constant dense<0.000000e+00> : vector<8xf32>
    %7 = vector.multi_reduction <add>, %6, %cst_3 [1] : vector<8x128xf32> to vector<8xf32>
    %8 = vector.shape_cast %7 : vector<8xf32> to vector<8x1xf32>
    %9 = math.log %8 : vector<8x1xf32>
    %10 = arith.addf %3, %9 : vector<8x1xf32>
    %11 = tpu.iota {dimensions = array<i32: 1>} : vector<8x128xi32>
    %12 = vector.broadcast %1 : vector<8x1xi32> to vector<8x128xi32>
    %13 = arith.cmpi eq, %11, %12 : vector<8x128xi32>
    %cst_4 = arith.constant 0.900781273 : f32
    %cst_5 = arith.constant 7.812500e-04 : f32
    %14 = vector.broadcast %cst_4 : f32 to vector<8x128xf32>
    %15 = vector.broadcast %cst_5 : f32 to vector<8x128xf32>
    %16 = arith.select %13, %14, %15 : vector<8x128xi1>, vector<8x128xf32>
    %17 = arith.mulf %16, %0 : vector<8x128xf32>
    %cst_6 = arith.constant dense<0.000000e+00> : vector<8xf32>
    %18 = vector.multi_reduction <add>, %17, %cst_6 [1] : vector<8x128xf32> to vector<8xf32>
    %19 = vector.shape_cast %18 : vector<8xf32> to vector<8x1xf32>
    %20 = arith.subf %10, %19 : vector<8x1xf32>
    %c0_7 = arith.constant 0 : index
    %c0_8 = arith.constant 0 : index
    %21 = vector.load %arg3[%c0_7, %c0_8] : memref<8x1xf32, #tpu.memory_space<vmem>>, vector<8x1xf32>
    tpu.vector_store %arg3[%c0_7, %c0_8], %20 {strides = array<i32>} : memref<8x1xf32, #tpu.memory_space<vmem>>, vector<8x1xf32>,
    return
  }
  func.func @transform_0(%arg0: i32) -> (i32, i32) {
    %c0_i32 = arith.constant 0 : i32
    %c0_i32_0 = arith.constant 0 : i32
    return %arg0, %c0_i32 : i32, i32
  }
  func.func @transform_1(%arg0: i32) -> (i32, i32) {
    %c0_i32 = arith.constant 0 : i32
    %c0_i32_0 = arith.constant 0 : i32
    return %arg0, %c0_i32 : i32, i32
  }
  func.func @transform_2(%arg0: i32) -> (i32, i32) {
    %c0_i32 = arith.constant 0 : i32
    %c0_i32_0 = arith.constant 0 : i32
    return %arg0, %c0_i32 : i32, i32
  }
}

</mosaic_0001>

<bundles_post_ra>
// kernel: tpu_custom_call.1
= control target key start
LH: loop header
LB: loop body
LE: loop exit
PB: predicated region body
PF: predicated region fallthrough
CT: control target
= control target key end

     0   :  { %v47_v1 = vmov 0   ;;  %v23_v7 = vlaneseq  ;;  %v48_v10 = vmov 0.00078125   ;;  %vm34_vm1 = vcmask 7168   ;;  %s73_s0 = inlined_call_operand.vmem [shape: f32[8,128], index: 0, kind: input, shape index: {}]   ;;  %s74_s1 = inlined_call_operand.vmem [shape: s32[8,1], index: 1, kind: input, shape index: {}]   ;;  %s75_s2 = inlined_call_operand.vmem [shape: f32[8,1], index: 2, kind: output, shape index: {}]  }
   0x1   :  { %v11_v0 = vld [vmem:[%s73_s0] sm:$0xff]  ;;  %42 = vset.pattern.permute.xlu0 %v47_v1 }
   0x2   :  { %13 = vmax.xlane.f32.xlu0 %v11_v0  ;;  %v12_v2 = vld [vmem:[%s74_s1] sm:$0xff]  ;;  %v24_v8 = vand.u32 127, %v23_v7 }
  0x16   :  { %26 = vperm.xlu0 %42, %v12_v2  }
  0x75   :  { %v14_v3 = vpop.xlane.xlu0 %13 }
  0x76   :  { %v15_v4 = vsub.f32 %v11_v0, %v14_v3 }
  0x78   :  { %v16_v5 = vmul.f32 1.442695, %v15_v4 }
  0x7a   :  { %43 = vpow2.f32 %v16_v5 }
  0x80   :  { %v44_v6 = vpop.eup %43 }
  0x81   :  { %18 = vadd.xlane.f32.xlu1 %v44_v6 }
  0x88   :  { %v27_v9 = vpop.permute.xlu0 %26 }
  0x89   :  { %vm28_vm0 = vcmp.eq.s32.totalorder %v24_v8, %v27_v9 }
  0x8a   :  { %v29_v11 = vsel %vm28_vm0, 0.9007813, %v48_v10 }
  0x8b   :  { %v30_v12 = vmul.f32 %v29_v11, %v11_v0 }
  0x8d   :  { %31 = vadd.xlane.f32.xlu1 %v30_v12 }
  0xf4   :  { %v19_v13 = vpop.xlane.xlu1 %18 }
  0xf5   :  { %45 = vlog2.f32 %v19_v13 }
  0xfb   :  { %v46_v14 = vpop.eup %45 }
  0xfc   :  { %v21_v15 = vmul.f32 0.6931472, %v46_v14 }
  0xfe   :  { %v22_v16 = vadd.f32 %v21_v15, %v14_v3 }
 0x100   :  { %v32_v17 = vpop.xlane.xlu1 %31 }
 0x101   :  { %v33_v18 = vsub.f32 %v22_v16, %v32_v17 }
 0x103   :  { %35 = vst.msk [vmem:[%s75_s2] sm:$0xff] %vm34_vm1, %v33_v18 }

</bundles_post_ra>
